<compile_context>
chip_gen: v7x
topology: tpu7x:2x2x1
jax: 0.10.0
libtpu: 0.0.40
codegen_flags: <defaults>
</compile_context>

<pallas_src>
import jax
import jax.numpy as jnp
from jax.experimental import pallas as pl
from jax.experimental.pallas import tpu as pltpu

_LANE = 128
_VMEM_LIMIT = 48 * 1024 * 1024        # v7x-safe (64 MiB physical VMEM)
_A_TILE_BUDGET = 24 * 1024 * 1024     # budget for double-buffered A row tile


def _round_up(x, m):
    return (x + m - 1) // m * m


def _pad2d(x, rows, cols):
    return jnp.pad(x, ((0, rows - x.shape[0]), (0, cols - x.shape[1])))


def _choose_row_tile(n, n_lane):
    """(row_tile, padded_row_count) for the M dim of the A@... matmuls.

    Rows only need sublane-multiple padding (16 for bf16, covers f32's 8);
    lanes stay 128-padded elsewhere.  Targets >=512-row tiles on large graphs
    while keeping 2 double-buffered (tile, n_lane) bf16 A tiles inside a
    v7x-safe VMEM budget.
    """
    if n <= 512:
        tm = _round_up(n, 16)
        return tm, tm
    budget_rows = _A_TILE_BUDGET // (2 * 2 * n_lane)   # 2 bufs x 2 B/elem
    tm = max(128, min(512, (budget_rows // 128) * 128))
    return tm, _round_up(n, tm)


def _pick_proj_tile(rows):
    for t in (512, 256, 128):
        if rows % t == 0:
            return t
    return rows


def _compiler_params():
    # TODO(synk): per-generation tuning (e.g. ~100 MiB limit + larger tiles on
    # v5e/v6e's 128 MiB VMEM) via pltpu.get_tpu_info().
    return pltpu.CompilerParams(dimension_semantics=("parallel",),
                                vmem_limit_bytes=_VMEM_LIMIT)


# ----------------------------- Pallas kernels --------------------------------

def _project_kernel(x_ref, w_ref, o_ref):
    """o_tile = x_tile @ w   (bf16 operands, f32 MXU accumulation)."""
    o_ref[...] = jnp.dot(x_ref[...], w_ref[...],
                         preferred_element_type=jnp.float32).astype(o_ref.dtype)


def _agg_relu_project_kernel(a_ref, xw_ref, b1_ref, w2_ref, o_ref):
    """o_tile = relu(A_tile @ XW + b1) @ W2.

    F.dropout(p=0.5, training=False) is the identity at inference.
    """
    h = jnp.dot(a_ref[...], xw_ref[...], preferred_element_type=jnp.float32)
    h = jnp.maximum(h + b1_ref[...], 0.0)
    # TODO(synk): training-mode dropout would need pltpu.prng_random_bits.
    o_ref[...] = jnp.dot(h.astype(jnp.bfloat16), w2_ref[...],
                         preferred_element_type=jnp.float32).astype(o_ref.dtype)


def _agg_bias_kernel(a_ref, hw_ref, b2_ref, o_ref):
    """o_tile = A_tile @ HW + b2."""
    out = jnp.dot(a_ref[...], hw_ref[...], preferred_element_type=jnp.float32)
    o_ref[...] = (out + b2_ref[...]).astype(o_ref.dtype)


# --------------------------- pallas_call wrappers -----------------------------

def _project(x_p, w_p):
    n_rows, k_p = x_p.shape
    d_p = w_p.shape[1]
    tp = _pick_proj_tile(n_rows)
    cost = pl.CostEstimate(
        flops=2 * n_rows * k_p * d_p, transcendentals=0,
        bytes_accessed=2 * (n_rows * k_p + k_p * d_p + n_rows * d_p))
    return pl.pallas_call(
        _project_kernel,
        out_shape=jax.ShapeDtypeStruct((n_rows, d_p), jnp.bfloat16),
        grid=(n_rows // tp,),
        in_specs=[pl.BlockSpec((tp, k_p), lambda i: (i, 0)),    # streamed X rows
                  pl.BlockSpec((k_p, d_p), lambda i: (0, 0))],  # resident W
        out_specs=pl.BlockSpec((tp, d_p), lambda i: (i, 0)),
        compiler_params=_compiler_params(),
        cost_estimate=cost,
    )(x_p, w_p)


def _agg_relu_project(a_p, xw, b1_p, w2_p, tm):
    n_row, n_lane = a_p.shape
    h_p = xw.shape[1]
    c_p = w2_p.shape[1]
    cost = pl.CostEstimate(
        flops=2 * n_row * (n_lane * h_p + h_p * c_p), transcendentals=0,
        bytes_accessed=2 * (n_row * n_lane + n_lane * h_p + h_p * c_p
                            + n_row * c_p) + 4 * h_p)
    return pl.pallas_call(
        _agg_relu_project_kernel,
        out_shape=jax.ShapeDtypeStruct((n_row, c_p), jnp.bfloat16),
        grid=(n_row // tm,),
        in_specs=[pl.BlockSpec((tm, n_lane), lambda i: (i, 0)),   # streamed A rows
                  pl.BlockSpec((n_lane, h_p), lambda i: (0, 0)),  # resident XW
                  pl.BlockSpec((1, h_p), lambda i: (0, 0)),       # b1
                  pl.BlockSpec((h_p, c_p), lambda i: (0, 0))],    # W2
        out_specs=pl.BlockSpec((tm, c_p), lambda i: (i, 0)),
        compiler_params=_compiler_params(),
        cost_estimate=cost,
    )(a_p, xw, b1_p, w2_p)


def _agg_bias(a_p, hw, b2_p, tm):
    n_row, n_lane = a_p.shape
    c_p = hw.shape[1]
    cost = pl.CostEstimate(
        flops=2 * n_row * n_lane * c_p, transcendentals=0,
        bytes_accessed=2 * (n_row * n_lane + n_lane * c_p)
                       + 4 * (c_p + n_row * c_p))
    return pl.pallas_call(
        _agg_bias_kernel,
        out_shape=jax.ShapeDtypeStruct((n_row, c_p), jnp.float32),
        grid=(n_row // tm,),
        in_specs=[pl.BlockSpec((tm, n_lane), lambda i: (i, 0)),   # streamed A rows
                  pl.BlockSpec((n_lane, c_p), lambda i: (0, 0)),  # resident HW
                  pl.BlockSpec((1, c_p), lambda i: (0, 0))],      # b2
        out_specs=pl.BlockSpec((tm, c_p), lambda i: (i, 0)),
        compiler_params=_compiler_params(),
        cost_estimate=cost,
    )(a_p, hw, b2_p)


def gcn_forward(params, x, a_hat):
    """Matches GCN.forward (eval mode): conv1 -> relu -> dropout(id) -> conv2."""
    n, f_in = x.shape
    hidden = params["w1"].shape[1]
    n_classes = params["w2"].shape[1]

    # Lane (last) dims padded to 128; row (M) dims only to the sublane/tile
    # multiple (asymmetric padding).
    n_lane = _round_up(n, _LANE)          # A columns == contraction-side rows
    f_p = _round_up(f_in, _LANE)
    h_p = _round_up(hidden, _LANE)
    c_p = _round_up(n_classes, _LANE)
    tm, n_row = _choose_row_tile(n, n_lane)

    a_p = _pad2d(a_hat, n_row, n_lane).astype(jnp.bfloat16)
    x_p = _pad2d(x, n_lane, f_p).astype(jnp.bfloat16)
    w1_p = _pad2d(params["w1"], f_p, h_p).astype(jnp.bfloat16)
    b1_p = _pad2d(params["b1"], 1, h_p).astype(jnp.float32)
    w2_p = _pad2d(params["w2"], h_p, c_p).astype(jnp.bfloat16)
    b2_p = _pad2d(params["b2"], 1, c_p).astype(jnp.float32)

    # Stage 1 (prologue): XW = X @ W1, computed once, reused by every A tile.
    xw = _project(x_p, w1_p)                              # (n_lane, h_p) bf16

    # Stage 2: HW_tile = relu(A_tile @ XW + b1) @ W2  (the layer-2 projection
    # is row-wise, so it fuses into the layer-1 aggregation epilogue).
    hw = _agg_relu_project(a_p, xw, b1_p, w2_p, tm)       # (n_row, c_p) bf16

    # HW is the contraction operand of the layer-2 aggregation -> resize its
    # row count to n_lane.  (Padded HW rows multiply zero A columns: harmless.)
    if n_row >= n_lane:
        hw = hw[:n_lane]
    else:
        hw = jnp.pad(hw, ((0, n_lane - n_row), (0, 0)))

    # Stage 3: OUT_tile = A_tile @ HW + b2.
    out_p = _agg_bias(a_p, hw, b2_p, tm)                  # (n_row, c_p) f32

    # NOTE: padded output rows carry broadcast b2 (not zeros) -- sliced off.
    return out_p[:n, :n_classes]


# ------------------------------- JAX glue ------------------------------------

def normalized_adjacency(edge_index, num_nodes):
    """Dense A_hat = D^-1/2 (A + I) D^-1/2 with PyG gcn_norm semantics.

    edge_index: (2, E) int32, [0]=source, [1]=target; messages flow src -> dst,
    so A[dst, src] accumulates.  Duplicate (non-self) edges are SUMMED (as PyG
    does); existing self loops are replaced so the diagonal is exactly 1.
    TODO(synk): dense N x N build is fine at demo size only; use CSR at scale.
    """
    src, dst = edge_index[0], edge_index[1]
    w = jnp.where(src == dst, 0.0, 1.0)                  # drop given self loops
    a = jnp.zeros((num_nodes, num_nodes), jnp.float32).at[dst, src].add(w)
    a = a + jnp.eye(num_nodes, dtype=jnp.float32)        # exactly one self loop
    deg = jnp.sum(a, axis=1)
    d_inv_sqrt = jnp.where(deg > 0, jax.lax.rsqrt(deg), 0.0)
    return a * d_inv_sqrt[:, None] * d_inv_sqrt[None, :]


def glorot(key, shape):
    fan_in, fan_out = shape
    limit = jnp.sqrt(6.0 / (fan_in + fan_out))
    return jax.random.uniform(key, shape, jnp.float32, -limit, limit)


def init_gcn_params(key, num_node_features, hidden_channels, num_classes):
    k1, k2 = jax.random.split(key)
    return {
        "w1": glorot(k1, (num_node_features, hidden_channels)),
        "b1": jnp.zeros((1, hidden_channels), jnp.float32),
        "w2": glorot(k2, (hidden_channels, num_classes)),
        "b2": jnp.zeros((1, num_classes), jnp.float32),
    }


def gcn_reference(params, x, a_hat):
    """Pure-JAX f32 reference of the same forward pass."""
    h = jnp.maximum(a_hat @ (x @ params["w1"]) + params["b1"], 0.0)
    return a_hat @ (h @ params["w2"]) + params["b2"]


# --------------------------------- main ---------------------------------------

if __name__ == "__main__":
    # Small graph; feature widths follow the module defaults (300 -> 128 -> 10).
    num_nodes = 64
    num_edges = 256
    num_node_features = 300
    hidden_channels = 128
    num_classes = 10

    key = jax.random.PRNGKey(0)
    kx, ke, kp = jax.random.split(key, 3)

    x = jax.random.normal(kx, (num_nodes, num_node_features), jnp.float32)
    edge_index = jax.random.randint(ke, (2, num_edges), 0, num_nodes, jnp.int32)

    params = init_gcn_params(kp, num_node_features, hidden_channels, num_classes)
    a_hat = normalized_adjacency(edge_index, num_nodes)

    out = jax.block_until_ready(gcn_forward(params, x, a_hat))

    assert out.shape == (num_nodes, num_classes)
    assert bool(jnp.all(jnp.isfinite(out)))

    # Numerical check vs the pure-JAX f32 reference (bf16 MXU operands, f32
    # accumulation -> allow a few percent drift relative to the logit scale).
    ref = gcn_reference(params, x, a_hat)
    rel_err = float(jnp.max(jnp.abs(out - ref)) / (jnp.max(jnp.abs(ref)) + 1e-6))
    assert rel_err < 5e-2, f"relative error too large: {rel_err}"

    print("KERNEL_OK")
</pallas_src>

<mosaic_0001>
module attributes {stable_mosaic.version = 11 : i64} {
  func.func @_project_kernel(%arg0: i32, %arg1: memref<128x384xbf16, #tpu.memory_space<vmem>>, %arg2: memref<384x128xbf16, #tpu.memory_space<vmem>>, %arg3: memref<128x128xbf16, #tpu.memory_space<vmem>>) attributes {dimension_semantics = [#tpu.dimension_semantics<parallel>], iteration_bounds = array<i64: 1>, scalar_prefetch = 0 : i64, scratch_operands = 0 : i64, tpu.core_type = #tpu.core_type<tc>, window_params = [{transform_indices = @transform_0, window_bounds = array<i64: 128, 384>}, {pipeline_mode = #tpu.pipeline_mode<synchronous>, transform_indices = @transform_1, window_bounds = array<i64: 384, 128>}, {transform_indices = @transform_2, window_bounds = array<i64: 128, 128>}]} {
    %c0 = arith.constant 0 : index
    %c0_0 = arith.constant 0 : index
    %0 = vector.load %arg1[%c0, %c0_0] : memref<128x384xbf16, #tpu.memory_space<vmem>>, vector<128x384xbf16>
    %c0_1 = arith.constant 0 : index
    %c0_2 = arith.constant 0 : index
    %1 = vector.load %arg2[%c0_1, %c0_2] : memref<384x128xbf16, #tpu.memory_space<vmem>>, vector<384x128xbf16>
    %cst = arith.constant dense<0.000000e+00> : vector<128x128xf32>
    %2 = tpu.matmul %0, %1, %cst {dimension_numbers = #tpu.dot_dimension_numbers<[1], [0], [0], [1], [0, 0, 1, 1], [], []>} : vector<128x384xbf16>, vector<384x128xbf16>, vector<128x128xf32> -> vector<128x128xf32>
    %3 = arith.truncf %2 : vector<128x128xf32> to vector<128x128xbf16>
    %c0_3 = arith.constant 0 : index
    %c0_4 = arith.constant 0 : index
    %4 = vector.load %arg3[%c0_3, %c0_4] : memref<128x128xbf16, #tpu.memory_space<vmem>>, vector<128x128xbf16>
    tpu.vector_store %arg3[%c0_3, %c0_4], %3 {strides = array<i32>} : memref<128x128xbf16, #tpu.memory_space<vmem>>, vector<128x128xbf16>,
    return
  }
  func.func @transform_0(%arg0: i32) -> (i32, i32) {
    %c0_i32 = arith.constant 0 : i32
    %c0_i32_0 = arith.constant 0 : i32
    return %arg0, %c0_i32 : i32, i32
  }
  func.func @transform_1(%arg0: i32) -> (i32, i32) {
    %c0_i32 = arith.constant 0 : i32
    %c0_i32_0 = arith.constant 0 : i32
    %c0_i32_1 = arith.constant 0 : i32
    return %c0_i32, %c0_i32_0 : i32, i32
  }
  func.func @transform_2(%arg0: i32) -> (i32, i32) {
    %c0_i32 = arith.constant 0 : i32
    %c0_i32_0 = arith.constant 0 : i32
    return %arg0, %c0_i32 : i32, i32
  }
}

</mosaic_0001>

<bundles_post_ra>
// kernel: tpu_custom_call.1
= control target key start
LH: loop header
LB: loop body
LE: loop exit
PB: predicated region body
PF: predicated region fallthrough
CT: control target
= control target key end

     0   :  { %7 = vsyncpa [#allocation3], 0  ;;  %s1123_s0 = inlined_call_operand.hbm [shape: bf16[128,384], index: 0, kind: input, shape index: {}]   ;;  %s1124_s1 = inlined_call_operand.hbm [shape: bf16[384,128], index: 1, kind: input, shape index: {}]   ;;  %s1125_s2 = inlined_call_operand.hbm [shape: bf16[128,128], index: 2, kind: output, shape index: {}]  }
   0x1   :  { %8 = vsyncpa [#allocation6], 0 }
   0x2   :  { %9 = vsyncpa [#allocation4], 0  ;;  %s1059_s9 = smov [#allocation2]   ;;  %s987_s13 = scalar_lea.hbm %s1123_s0, 3072 }
   0x3   :  { %s15_s10 = sshll.u32 %s1059_s9, 4  ;;  %p988_p0 = scmp.ne.s32.totalorder %s1123_s0, %s987_s13  ;;  %s16_s10 = int_to_ptr.vmem [resolvable:$true] %s15_s10 }
   0x4   :  { %p991_p1 = scmp.lt.u32.totalorder %s987_s13, %s1123_s0 }
   0x6   :  { %p993_p2 = pnand %p991_p1, %p988_p0 }
   0x8   :  { %996 = shalt.err (!%p993_p2)
}
   0x9   :  { %s997_s18 = scalar_lea.vmem %s16_s10, 3072  ;;  %p1002_p4 = scmp.lt.s32.totalorder %s16_s10, %s16_s10 }
   0xa   :  { %p998_p3 = scmp.ne.s32.totalorder %s16_s10, %s997_s18  ;;  %p1003_p5 = scmp.lt.s32.totalorder %s997_s18, %s997_s18 }
   0xc   :  { %p1004_p6 = por %p1003_p5, %p1002_p4 }
   0xe   :  { %p1005_p7 = pnand %p1004_p6, %p998_p3 }
  0x10   :  { %1008 = shalt.err (!%p1005_p7)
}
  0x11   :  { %s1060_s19 = smov 192   ;;  %s1061_s20 = smov 12  }
  0x12   :  { %21 = dma.hbm_to_vmem [thread:$0]  %s1123_s0, 3072, %s16_s10, [#allocation3], %s1060_s19, %s1060_s19, %s1061_s20  }
  0x13   :  { %s1062_s23 = smov [#allocation5]   ;;  %s1009_s27 = scalar_lea.hbm %s1124_s1, 3072 }
  0x14   :  { %s27_s24 = sshll.u32 %s1062_s23, 4  ;;  %p1010_p8 = scmp.ne.s32.totalorder %s1124_s1, %s1009_s27  ;;  %s28_s24 = int_to_ptr.vmem [resolvable:$true] %s27_s24 }
  0x15   :  { %p1013_p9 = scmp.lt.u32.totalorder %s1009_s27, %s1124_s1 }
  0x17   :  { %p1015_p10 = pnand %p1013_p9, %p1010_p8 }
  0x19   :  { %1018 = shalt.err (!%p1015_p10)
}
  0x1a   :  { %s1019_s4 = scalar_lea.vmem %s28_s24, 3072  ;;  %p1024_p12 = scmp.lt.s32.totalorder %s28_s24, %s28_s24 }
  0x1b   :  { %p1020_p11 = scmp.ne.s32.totalorder %s28_s24, %s1019_s4  ;;  %p1025_p13 = scmp.lt.s32.totalorder %s1019_s4, %s1019_s4 }
  0x1d   :  { %p1026_p0 = por %p1025_p13, %p1024_p12 }
  0x1f   :  { %p1027_p1 = pnand %p1026_p0, %p1020_p11 }
  0x21   :  { %1030 = shalt.err (!%p1027_p1)
}
  0x22   :  { %s1063_s0 = smov 64   ;;  %s1064_s5 = smov 4  }
  0x23   :  { %33 = dma.hbm_to_vmem [thread:$0]  %s1124_s1, 3072, %s28_s24, [#allocation6], %s1063_s0, %s1063_s0, %s1064_s5  }
  0x24   :  { %1053 = dma.done.wait [#allocation3], 3072  }
  0x25   :  { %1054 = vsyncadd [#allocation3], 4294964224 }
  0x26   :  { %1055 = dma.done.wait [#allocation6], 3072  }
  0x27   :  { %1056 = vsyncadd [#allocation6], 4294964224  ;;  %v931_v0 = vld [vmem:[#allocation5 + $0x40] sm:$0xff]   ;;  %v934_v3 = vld [vmem:[#allocation5 + $0x48] sm:$0xff]   ;;  %s1065_s1 = smov [#allocation7]  }
  0x28   :  { %v932_v1 = vld [vmem:[#allocation5] sm:$0xff]   ;;  %812 = vmatprep.subr.bf16.mxu0 %v931_v0  ;;  %v935_v4 = vld [vmem:[#allocation5 + $0x8] sm:$0xff]   ;;  %v937_v6 = vld [vmem:[#allocation5 + $0x50] sm:$0xff]   ;;  %s672_s8 = sshll.u32 %s1065_s1, 4  ;;  %s673_s8 = int_to_ptr.vmem [resolvable:$true] %s672_s8 }
  0x29   :  { %v933_v2 = vld [vmem:[#allocation5 + $0x80] sm:$0xff]   ;;  %813 = vmatpush3.bf16.msra.mxu0 %v932_v1  ;;  %v936_v5 = vld [vmem:[#allocation5 + $0x88] sm:$0xff]   ;;  %v938_v7 = vld [vmem:[#allocation5 + $0x10] sm:$0xff]   ;;  %s1031_s9 = scalar_lea.vmem %s673_s8, 1024  ;;  %p1036_p3 = scmp.lt.s32.totalorder %s673_s8, %s673_s8 }
  0x2a   :  { %892 = vmatprep.subr.bf16.mxu1 %v933_v2  ;;  %814 = vmatprep.subr.bf16.mxu0 %v934_v3  ;;  %v939_v8 = vld [vmem:[#allocation5 + $0x90] sm:$0xff]   ;;  %v940_v9 = vld [vmem:[#allocation5 + $0x58] sm:$0xff]   ;;  %v943_v12 = vld [vmem:[#allocation5 + $0x60] sm:$0xff]   ;;  %p1032_p2 = scmp.ne.s32.totalorder %s673_s8, %s1031_s9  ;;  %p1037_p4 = scmp.lt.s32.totalorder %s1031_s9, %s1031_s9 }
  0x2b   :  { %893 = vmatpush3.bf16.msra.mxu1 %v933_v2  ;;  %v941_v10 = vld [vmem:[#allocation5 + $0x18] sm:$0xff]   ;;  %v945_v13 = vld [vmem:[#allocation5 + $0xa0] sm:$0xff]   ;;  %v946_v15 = vld [vmem:[#allocation5 + $0x68] sm:$0xff]  }
  0x2c   :  { %894 = vmatprep.subr.bf16.mxu1 %v936_v5  ;;  %v942_v11 = vld [vmem:[#allocation5 + $0x98] sm:$0xff]   ;;  %v944_v14 = vld [vmem:[#allocation5 + $0x20] sm:$0xff]   ;;  %v948_v16 = vld [vmem:[#allocation5 + $0xa8] sm:$0xff]   ;;  %p1038_p5 = por %p1037_p4, %p1036_p3 }
  0x2d   :  { %815 = vmatpush3.bf16.msra.mxu0 %v935_v4  ;;  %v947_v17 = vld [vmem:[#allocation5 + $0x28] sm:$0xff]   ;;  %v949_v18 = vld [vmem:[#allocation5 + $0x70] sm:$0xff]   ;;  %v952_v21 = vld [vmem:[#allocation5 + $0x78] sm:$0xff]  }
  0x2e   :  { %816 = vmatprep.subr.bf16.mxu0 %v937_v6  ;;  %v950_v19 = vld [vmem:[#allocation5 + $0x30] sm:$0xff]   ;;  %v954_v22 = vld [vmem:[#allocation5 + $0xb8] sm:$0xff]   ;;  %v955_v26 = vld [vmem:[#allocation2] ss:$12 sps:$4 sm:$0xff]   ;;  %p1039_p6 = pnand %p1038_p5, %p1032_p2 }
  0x2f   :  { %895 = vmatpush3.bf16.msra.mxu1 %v936_v5  ;;  %v951_v20 = vld [vmem:[#allocation5 + $0xb0] sm:$0xff]   ;;  %v953_v25 = vld [vmem:[#allocation5 + $0x38] sm:$0xff]   ;;  %v959_v28 = vld [vmem:[#allocation2 + $0x20] ss:$12 sps:$4 sm:$0xff]  }
  0x30   :  { %896 = vmatprep.subr.bf16.mxu1 %v939_v8  ;;  %v957_v23 = vld [vmem:[#allocation2 + $0x4] ss:$12 sps:$4 sm:$0xff]   ;;  %v958_v24 = vld [vmem:[#allocation2 + $0x8] ss:$12 sps:$4 sm:$0xff]   ;;  %v968_v35 = vld [vmem:[#allocation2 + $0x4c] ss:$12 sps:$4 sm:$0xff]  }
  0x31   :  { %817 = vmatpush3.bf16.msra.mxu0 %v938_v7  ;;  %425 = vmatprep.mubr.bf16.mxu0 %v957_v23  ;;  %v960_v27 = vld [vmem:[#allocation2 + $0x1c] ss:$12 sps:$4 sm:$0xff]   ;;  %v966_v29 = vld [vmem:[#allocation2 + $0x38] ss:$12 sps:$4 sm:$0xff]   ;;  %v963_v31 = vld [vmem:[#allocation2 + $0x34] ss:$12 sps:$4 sm:$0xff]  }
  0x32   :  { %818 = vmatprep.subr.bf16.mxu0 %v940_v9  ;;  %908 = vmatprep.mubr.bf16.mxu1 %v958_v24  ;;  %v962_v30 = vld [vmem:[#allocation2 + $0x18] ss:$12 sps:$4 sm:$0xff]   ;;  %v967_v32 = vld [vmem:[#allocation2 + $0x50] ss:$12 sps:$4 sm:$0xff]   ;;  %v974_v33 = vld [vmem:[#allocation2 + $0x68] ss:$12 sps:$4 sm:$0xff]  }
  0x33   :  { %897 = vmatpush3.bf16.msra.mxu1 %v939_v8  ;;  %v965_v34 = vld [vmem:[#allocation2 + $0x30] ss:$12 sps:$4 sm:$0xff]   ;;  %v975_v36 = vld [vmem:[#allocation2 + $0x80] ss:$12 sps:$4 sm:$0xff]   ;;  %v982_v37 = vld [vmem:[#allocation2 + $0x98] ss:$12 sps:$4 sm:$0xff]  }
  0x34   :  { %898 = vmatprep.subr.bf16.mxu1 %v942_v11  ;;  %v970_v38 = vld [vmem:[#allocation2 + $0x48] ss:$12 sps:$4 sm:$0xff]   ;;  %v971_v39 = vld [vmem:[#allocation2 + $0x64] ss:$12 sps:$4 sm:$0xff]   ;;  %v973_v41 = vld [vmem:[#allocation2 + $0x60] ss:$12 sps:$4 sm:$0xff]  }
  0x35   :  { %819 = vmatpush3.bf16.msra.mxu0 %v941_v10  ;;  %v983_v40 = vld [vmem:[#allocation2 + $0xb0] ss:$12 sps:$4 sm:$0xff]   ;;  %v978_v43 = vld [vmem:[#allocation2 + $0x78] ss:$12 sps:$4 sm:$0xff]   ;;  %v979_v44 = vld [vmem:[#allocation2 + $0x94] ss:$12 sps:$4 sm:$0xff]  }
  0x36   :  { %820 = vmatprep.subr.bf16.mxu0 %v943_v12  ;;  %v976_v42 = vld [vmem:[#allocation2 + $0x7c] ss:$12 sps:$4 sm:$0xff]   ;;  %v984_v46 = vld [vmem:[#allocation2 + $0xac] ss:$12 sps:$4 sm:$0xff]  }
  0x37   :  { %899 = vmatpush3.bf16.msra.mxu1 %v942_v11  ;;  %v981_v45 = vld [vmem:[#allocation2 + $0x90] ss:$12 sps:$4 sm:$0xff]   ;;  %v986_v47 = vld [vmem:[#allocation2 + $0xa8] ss:$12 sps:$4 sm:$0xff]  }
  0x38   :  { %900 = vmatprep.subr.bf16.mxu1 %v945_v13 }
  0x39   :  { %821 = vmatpush3.bf16.msra.mxu0 %v944_v14 }
  0x3a   :  { %822 = vmatprep.subr.bf16.mxu0 %v946_v15 }
  0x3b   :  { %901 = vmatpush3.bf16.msra.mxu1 %v945_v13 }
  0x3c   :  { %902 = vmatprep.subr.bf16.mxu1 %v948_v16 }
  0x3d   :  { %823 = vmatpush3.bf16.msra.mxu0 %v947_v17 }
  0x3e   :  { %824 = vmatprep.subr.bf16.mxu0 %v949_v18 }
  0x3f   :  { %903 = vmatpush3.bf16.msra.mxu1 %v948_v16 }
  0x40   :  { %904 = vmatprep.subr.bf16.mxu1 %v951_v20 }
  0x41   :  { %825 = vmatpush3.bf16.msra.mxu0 %v950_v19 }
  0x42   :  { %826 = vmatprep.subr.bf16.mxu0 %v952_v21 }
  0x43   :  { %905 = vmatpush3.bf16.msra.mxu1 %v951_v20 }
  0x44   :  { %906 = vmatprep.subr.bf16.mxu1 %v954_v22 }
  0x45   :  { %827 = vmatpush3.bf16.msra.mxu0 %v953_v25 }
  0x47   :  { %907 = vmatpush3.bf16.msra.mxu1 %v954_v22 }
  0x48   :  { %426 = vmatmul.mubr.bf16.vlgmr.msra.gmra.mrb[0].mxu0 %v955_v26 }
  0x49   :  { %433 = vmatprep.mubr.bf16.mxu0 %v960_v27 }
  0x4a   :  { %909 = vmatmul.mubr.bf16.vlgmr.msra.gmra.mrb[0].mxu1 %v959_v28 }
  0x4b   :  { %912 = vmatprep.mubr.bf16.mxu1 %v966_v29 }
  0x50   :  { %434 = vmatmul.mubr.bf16.gmra.mrb[4].mxu0 %v962_v30 }
  0x51   :  { %441 = vmatprep.mubr.bf16.mxu0 %v963_v31 }
  0x52   :  { %913 = vmatmul.mubr.bf16.gmra.mrb[4].mxu1 %v967_v32 }
  0x53   :  { %916 = vmatprep.mubr.bf16.mxu1 %v974_v33 }
  0x58   :  { %442 = vmatmul.mubr.bf16.gmra.mrb[8].mxu0 %v965_v34 }
  0x59   :  { %449 = vmatprep.mubr.bf16.mxu0 %v968_v35 }
  0x5a   :  { %917 = vmatmul.mubr.bf16.gmra.mrb[8].mxu1 %v975_v36 }
  0x5b   :  { %920 = vmatprep.mubr.bf16.mxu1 %v982_v37 }
  0x60   :  { %450 = vmatmul.mubr.bf16.gmra.mrb[12].mxu0 %v970_v38 }
  0x61   :  { %457 = vmatprep.mubr.bf16.mxu0 %v971_v39 }
  0x62   :  { %921 = vmatmul.mubr.bf16.gmra.mrb[12].mxu1 %v983_v40 }
  0x68   :  { %458 = vmatmul.mubr.bf16.gmra.mrb[16].mxu0 %v973_v41 }
  0x69   :  { %465 = vmatprep.mubr.bf16.mxu0 %v976_v42 }
  0x70   :  { %466 = vmatmul.mubr.bf16.gmra.mrb[20].mxu0 %v978_v43 }
  0x71   :  { %473 = vmatprep.mubr.bf16.mxu0 %v979_v44 }
  0x78   :  { %474 = vmatmul.mubr.bf16.gmra.mrb[24].mxu0 %v981_v45 }
  0x79   :  { %481 = vmatprep.mubr.bf16.mxu0 %v984_v46 }
  0x80   :  { %482 = vmatmul.mubr.bf16.gmra.mrb[28].mxu0 %v986_v47 }
 0x11b   :  { %v828_v48 = vpop.f32.mrb[0].mxu0 }
 0x11c   :  { %v829_v49 = vpop.f32.mrb[1].mxu0 }
 0x11d   :  { %v830_v50 = vadd.f32 %v829_v49, %v828_v48  ;;  %v831_v51 = vpop.f32.mrb[2].mxu0  ;;  %v910_v52 = vpop.f32.mrb[0].mxu1 }
 0x11e   :  { %v832_v53 = vpop.f32.mrb[3].mxu0  ;;  %v524_v54 = vpop.f32.mrb[1].mxu1 }
 0x11f   :  { %v833_v55 = vadd.f32 %v832_v53, %v831_v51  ;;  %v525_v56 = vadd.f32 %v830_v50, %v524_v54  ;;  %v911_v57 = vpop.f32.mrb[2].mxu1 }
 0x120   :  { %v527_v58 = vpop.f32.mrb[3].mxu1 }
 0x121   :  { %v528_v59 = vadd.f32 %v833_v55, %v527_v58 }
 0x123   :  { %v768_v60 = vpack.c.bf16 %v528_v59, %v525_v56  ;;  %v834_v61 = vpop.f32.mrb[4].mxu0 }
 0x124   :  { %v835_v62 = vpop.f32.mrb[5].mxu0 }
 0x125   :  { %769 = vst [vmem:[#allocation7] sm:$0xff] %v768_v60   ;;  %v836_v63 = vadd.f32 %v835_v62, %v834_v61  ;;  %v837_v0 = vpop.f32.mrb[6].mxu0  ;;  %v914_v1 = vpop.f32.mrb[4].mxu1 }
 0x126   :  { %v838_v2 = vpop.f32.mrb[7].mxu0  ;;  %v540_v3 = vpop.f32.mrb[5].mxu1 }
 0x127   :  { %v533_v4 = vadd.f32 %v910_v52, %v836_v63  ;;  %v839_v5 = vadd.f32 %v838_v2, %v837_v0  ;;  %v915_v6 = vpop.f32.mrb[6].mxu1 }
 0x128   :  { %v543_v7 = vpop.f32.mrb[7].mxu1 }
 0x129   :  { %v536_v8 = vadd.f32 %v911_v57, %v839_v5 }
 0x12b   :  { %v773_v9 = vpack.c.bf16 %v536_v8, %v533_v4  ;;  %v840_v10 = vpop.f32.mrb[8].mxu0 }
 0x12c   :  { %v841_v11 = vpop.f32.mrb[9].mxu0 }
 0x12d   :  { %805 = vst [vmem:[#allocation7 + $0x8] sm:$0xff] %v773_v9   ;;  %v842_v12 = vadd.f32 %v841_v11, %v840_v10  ;;  %v843_v13 = vpop.f32.mrb[10].mxu0  ;;  %v918_v14 = vpop.f32.mrb[8].mxu1 }
 0x12e   :  { %v844_v15 = vpop.f32.mrb[11].mxu0  ;;  %v556_v16 = vpop.f32.mrb[9].mxu1 }
 0x12f   :  { %v845_v17 = vadd.f32 %v844_v15, %v843_v13  ;;  %v541_v18 = vadd.f32 %v842_v12, %v540_v3  ;;  %v919_v19 = vpop.f32.mrb[10].mxu1 }
 0x130   :  { %v559_v20 = vpop.f32.mrb[11].mxu1 }
 0x131   :  { %v544_v21 = vadd.f32 %v845_v17, %v543_v7 }
 0x133   :  { %v778_v22 = vpack.c.bf16 %v544_v21, %v541_v18  ;;  %v846_v23 = vpop.f32.mrb[12].mxu0 }
 0x134   :  { %v847_v24 = vpop.f32.mrb[13].mxu0 }
 0x135   :  { %806 = vst [vmem:[#allocation7 + $0x10] sm:$0xff] %v778_v22   ;;  %v848_v25 = vadd.f32 %v847_v24, %v846_v23  ;;  %v849_v26 = vpop.f32.mrb[14].mxu0  ;;  %v922_v27 = vpop.f32.mrb[12].mxu1 }
 0x136   :  { %v850_v28 = vpop.f32.mrb[15].mxu0  ;;  %v572_v29 = vpop.f32.mrb[13].mxu1 }
 0x137   :  { %v549_v30 = vadd.f32 %v914_v1, %v848_v25  ;;  %v851_v31 = vadd.f32 %v850_v28, %v849_v26  ;;  %v923_v32 = vpop.f32.mrb[14].mxu1 }
 0x138   :  { %v575_v33 = vpop.f32.mrb[15].mxu1 }
 0x139   :  { %v552_v34 = vadd.f32 %v915_v6, %v851_v31 }
 0x13b   :  { %v783_v35 = vpack.c.bf16 %v552_v34, %v549_v30  ;;  %v852_v36 = vpop.f32.mrb[16].mxu0 }
 0x13c   :  { %v853_v37 = vpop.f32.mrb[17].mxu0 }
 0x13d   :  { %807 = vst [vmem:[#allocation7 + $0x18] sm:$0xff] %v783_v35   ;;  %v854_v38 = vadd.f32 %v853_v37, %v852_v36  ;;  %v855_v39 = vpop.f32.mrb[18].mxu0 }
 0x13e   :  { %v856_v40 = vpop.f32.mrb[19].mxu0 }
 0x13f   :  { %v857_v41 = vadd.f32 %v856_v40, %v855_v39  ;;  %v557_v42 = vadd.f32 %v854_v38, %v556_v16 }
 0x141   :  { %v560_v43 = vadd.f32 %v857_v41, %v559_v20 }
 0x143   :  { %v788_v44 = vpack.c.bf16 %v560_v43, %v557_v42  ;;  %v858_v45 = vpop.f32.mrb[20].mxu0 }
 0x144   :  { %v859_v46 = vpop.f32.mrb[21].mxu0 }
 0x145   :  { %808 = vst [vmem:[#allocation7 + $0x20] sm:$0xff] %v788_v44   ;;  %v860_v47 = vadd.f32 %v859_v46, %v858_v45  ;;  %v861_v48 = vpop.f32.mrb[22].mxu0 }
 0x146   :  { %v862_v49 = vpop.f32.mrb[23].mxu0 }
 0x147   :  { %v565_v50 = vadd.f32 %v918_v14, %v860_v47  ;;  %v863_v51 = vadd.f32 %v862_v49, %v861_v48 }
 0x149   :  { %v568_v52 = vadd.f32 %v919_v19, %v863_v51 }
 0x14b   :  { %v793_v53 = vpack.c.bf16 %v568_v52, %v565_v50  ;;  %v864_v54 = vpop.f32.mrb[24].mxu0 }
 0x14c   :  { %v865_v55 = vpop.f32.mrb[25].mxu0 }
 0x14d   :  { %809 = vst [vmem:[#allocation7 + $0x28] sm:$0xff] %v793_v53   ;;  %v866_v56 = vadd.f32 %v865_v55, %v864_v54  ;;  %v867_v57 = vpop.f32.mrb[26].mxu0 }
 0x14e   :  { %v868_v58 = vpop.f32.mrb[27].mxu0 }
 0x14f   :  { %v869_v59 = vadd.f32 %v868_v58, %v867_v57  ;;  %v573_v60 = vadd.f32 %v866_v56, %v572_v29 }
 0x151   :  { %v576_v61 = vadd.f32 %v869_v59, %v575_v33 }
 0x153   :  { %v798_v62 = vpack.c.bf16 %v576_v61, %v573_v60  ;;  %v870_v63 = vpop.f32.mrb[28].mxu0 }
 0x154   :  { %v871_v0 = vpop.f32.mrb[29].mxu0 }
 0x155   :  { %810 = vst [vmem:[#allocation7 + $0x30] sm:$0xff] %v798_v62   ;;  %v872_v1 = vadd.f32 %v871_v0, %v870_v63  ;;  %v873_v2 = vpop.f32.mrb[30].mxu0 }
 0x156   :  { %v874_v3 = vpop.f32.mrb[31].mxu0 }
 0x157   :  { %v581_v4 = vadd.f32 %v922_v27, %v872_v1  ;;  %v875_v5 = vadd.f32 %v874_v3, %v873_v2 }
 0x159   :  { %v584_v6 = vadd.f32 %v923_v32, %v875_v5 }
 0x15b   :  { %v803_v7 = vpack.c.bf16 %v584_v6, %v581_v4 }
 0x15d   :  { %811 = vst [vmem:[#allocation7 + $0x38] sm:$0xff] %v803_v7  }
 0x15e   :  { %1042 = shalt.err (!%p1039_p6)
}
 0x15f   :  { %s1043_s12 = scalar_lea.hbm %s1125_s2, 1024 }
 0x160   :  { %p1044_p7 = scmp.ne.s32.totalorder %s1125_s2, %s1043_s12  ;;  %p1047_p8 = scmp.lt.u32.totalorder %s1043_s12, %s1125_s2 }
 0x162   :  { %p1049_p9 = pnand %p1047_p8, %p1044_p7 }
 0x164   :  { %1052 = shalt.err (!%p1049_p9)
}
 0x165   :  { %678 = dma.vmem_to_hbm [thread:$0]  %s673_s8, 1024, %s1125_s2, [#allocation4], %s1063_s0, %s1063_s0, %s1064_s5  }
 0x166   :  { %1057 = dma.done.wait [#allocation4], 1024  }
 0x167   :  { %1058 = vsyncadd [#allocation4], 4294966272 }
 0x168   :  { %682 = vsyncpa [#allocation3], 1 }
 0x169   :  { %683 = vsyncpa [#allocation6], 1 }
 0x16a   :  { %684 = vsyncpa [#allocation4], 1 }

</bundles_post_ra>
